<compile_context>
chip_gen: v5e
topology: v5e:2x2
jax: 0.10.0
libtpu: 0.0.40
codegen_flags: <defaults>
</compile_context>

<pallas_src>
import math

import jax
import jax.numpy as jnp
from jax import lax
from jax.experimental import pallas as pl
from jax.experimental.pallas import tpu as pltpu


def _tpu_hw_info():
    """Return (vmem_capacity_bytes, num_tensorcores_per_chip) with safe fallbacks."""
    vmem_cap = None
    try:
        info = pltpu.get_tpu_info()
        vmem_cap = int(getattr(info, "vmem_capacity_bytes", 0)) or None
    except Exception:
        vmem_cap = None
    kind = ""
    try:
        kind = jax.devices()[0].device_kind.lower()
    except Exception:
        pass
    num_tc = 2 if "v7" in kind else 1
    if vmem_cap is None:
        vmem_cap = (64 << 20) if "v7" in kind else (128 << 20)
    return vmem_cap, num_tc


def _block_bytes(tt, tb, n, spike_itemsize, full_state):
    """Pipeline VMEM footprint for one (tt, tb, n) block (double-buffered streams)."""
    per = 2 * tt * tb * n * 4                 # x input (2 buffers)
    per += 2 * tt * tb * n * spike_itemsize   # spike output (2 buffers)
    per += 2 * tb * n * 4                     # mem0 input (2 buffers)
    if full_state:
        per += 2 * tt * tb * n * 4            # per-step mem log output (2 buffers)
    else:
        per += 2 * tb * n * 4                 # final-state output (2 buffers)
    per += tb * n * 4                         # mem scratch accumulator
    return per


def _pick_tiles(T, B, n_pad, spike_itemsize, full_state, budget, num_tc):
    """Pick (TT time-chunk, tb batch-tile).  tb obeys the sublane granularity of
    the narrowest output dtype; on 2-TC chips force nb >= 2 when possible."""
    sub = max(8, 32 // spike_itemsize)        # f32->8, bf16->16, int8->32 sublanes
    tb_cands = [tb for tb in range(sub, B + 1, sub) if B % tb == 0]
    if B not in tb_cands:
        tb_cands.append(B)                    # full-dim block is always legal
    if num_tc >= 2 and B >= 2 * sub:
        multi = [tb for tb in tb_cands if B // tb >= num_tc]
        if multi:
            tb_cands = multi                  # keep both TensorCores busy (v7x)
    tt_cands = [d for d in range(1, T + 1) if T % d == 0]

    x_block_cap = 2 << 20                     # ~2 MiB per x-stream block
    best_key, best = None, (1, min(tb_cands))
    for tb in tb_cands:
        for tt in tt_cands:
            if 4 * tt * tb * n_pad > x_block_cap:
                continue
            if _block_bytes(tt, tb, n_pad, spike_itemsize, full_state) > budget:
                continue
            key = (tt * tb, tt)               # prefer bigger blocks, then longer chunks
            if best_key is None or key > best_key:
                best_key, best = key, (tt, tb)
    return best


def make_sequence_no_reset_neuron(size, params, *, full_state=False,
                                  spike_dtype=jnp.bfloat16):
    """Build (forward, initial_mem) mirroring SequenceWrapperFull(NoResetNeuron)."""
    beta = math.exp(-1.0 / params["TAU"])
    if params["1-beta"] == "improved":
        factor = (1.0 - beta ** 2) ** 0.5
    elif params["1-beta"]:
        factor = 1.0 - beta
    else:
        factor = 1.0

    initial_mem = jnp.zeros((size,), dtype=jnp.float32)

    vmem_cap, num_tc = _tpu_hw_info()
    budget = vmem_cap // 2                    # block-pipeline budget
    vmem_limit = int(vmem_cap * 0.75)         # explicit scoped-VMEM limit

    spike_itemsize = jnp.dtype(spike_dtype).itemsize

    @jax.jit
    def forward(inp, h_mem):
        """inp: [T, B, size] f32, h_mem: [B, size] f32."""
        T, B, N = inp.shape
        assert N == size

        # Lane-dense padding: last dim a multiple of 128 (zeros are inert).
        n_pad = ((N + 127) // 128) * 128
        if n_pad != N:
            inp = jnp.pad(inp, ((0, 0), (0, 0), (0, n_pad - N)))
            h_mem = jnp.pad(h_mem, ((0, 0), (0, n_pad - N)))

        tt, tb = _pick_tiles(T, B, n_pad, spike_itemsize, full_state, budget, num_tc)
        nb, nt = B // tt if False else B // tb, T // tt
        unroll = True if tt <= 16 else 8

        # ---- kernels (close over tt / unroll) -----------------------------
        def kernel_last(x_ref, mem0_ref, spikes_ref, memout_ref, mem_sc):
            tc = pl.program_id(1)

            @pl.when(tc == 0)
            def _init():
                mem_sc[...] = mem0_ref[...]

            def step(i, mem):
                new_mem = beta * mem + factor * x_ref[i]
                spikes_ref[i] = (new_mem > 1.0).astype(spikes_ref.dtype)
                return new_mem

            mem_final = lax.fori_loop(0, tt, step, mem_sc[...], unroll=unroll)
            mem_sc[...] = mem_final

            @pl.when(tc == pl.num_programs(1) - 1)
            def _final():
                memout_ref[...] = mem_final

        def kernel_full(x_ref, mem0_ref, spikes_ref, memseq_ref, mem_sc):
            tc = pl.program_id(1)

            @pl.when(tc == 0)
            def _init():
                mem_sc[...] = mem0_ref[...]

            def step(i, mem):
                new_mem = beta * mem + factor * x_ref[i]
                spikes_ref[i] = (new_mem > 1.0).astype(spikes_ref.dtype)
                memseq_ref[i] = new_mem
                return new_mem

            mem_final = lax.fori_loop(0, tt, step, mem_sc[...], unroll=unroll)
            mem_sc[...] = mem_final

        # ---- specs ---------------------------------------------------------
        x_spec = pl.BlockSpec((tt, tb, n_pad), lambda i, t: (t, i, 0))
        mem_in_spec = pl.BlockSpec((tb, n_pad), lambda i, t: (i, 0))
        spike_spec = pl.BlockSpec((tt, tb, n_pad), lambda i, t: (t, i, 0))

        if full_state:
            kernel = kernel_full
            out_shape = (
                jax.ShapeDtypeStruct((T, B, n_pad), spike_dtype),
                jax.ShapeDtypeStruct((T, B, n_pad), jnp.float32),
            )
            out_specs = [spike_spec,
                         pl.BlockSpec((tt, tb, n_pad), lambda i, t: (t, i, 0))]
        else:
            kernel = kernel_last
            out_shape = (
                jax.ShapeDtypeStruct((T, B, n_pad), spike_dtype),
                jax.ShapeDtypeStruct((B, n_pad), jnp.float32),
            )
            out_specs = [spike_spec,
                         pl.BlockSpec((tb, n_pad), lambda i, t: (i, 0))]

        spikes, mem_out = pl.pallas_call(
            kernel,
            out_shape=out_shape,
            grid_spec=pltpu.PrefetchScalarGridSpec(
                num_scalar_prefetch=0,
                grid=(nb, nt),
                in_specs=[x_spec, mem_in_spec],
                out_specs=out_specs,
                scratch_shapes=[pltpu.VMEM((tb, n_pad), jnp.float32)],
            ),
            compiler_params=pltpu.CompilerParams(
                dimension_semantics=("parallel", "arbitrary"),
                vmem_limit_bytes=vmem_limit,
            ),
        )(inp, h_mem)

        if n_pad != N:
            spikes = spikes[..., :N]
            mem_out = mem_out[..., :N]
        return spikes, {"mem": mem_out}

    return forward, initial_mem


def reference_sequence(inp, mem, beta, factor):
    """Pure-JAX reference: per-step spikes, per-step mems, final mem."""
    spikes, mems = [], []
    for t in range(inp.shape[0]):
        mem = beta * mem + factor * inp[t]
        spikes.append((mem - 1.0 > 0.0).astype(jnp.float32))
        mems.append(mem)
    return jnp.stack(spikes), jnp.stack(mems), mem


if __name__ == "__main__":
    params = {"TAU": 20.0, "1-beta": "improved", "SPIKE_FN": "bellec"}
    beta = math.exp(-1.0 / params["TAU"])
    factor = (1.0 - beta ** 2) ** 0.5

    # --- main test: N multiple of 128 --------------------------------------
    T, BATCH, SIZE = 16, 8, 128
    fwd_last, initial_mem = make_sequence_no_reset_neuron(SIZE, params)
    fwd_full, _ = make_sequence_no_reset_neuron(SIZE, params, full_state=True)

    key = jax.random.PRNGKey(0)
    kx, km, kx2, km2 = jax.random.split(key, 4)
    inp = jax.random.normal(kx, (T, BATCH, SIZE), dtype=jnp.float32) * 2.0
    # get_initial_state: mem broadcast to [B, size]; perturb to exercise beta*mem.
    h_mem = jnp.broadcast_to(initial_mem, (BATCH, SIZE)) + \
        jax.random.normal(km, (BATCH, SIZE), dtype=jnp.float32)

    ref_spikes, ref_mems, ref_final = reference_sequence(inp, h_mem, beta, factor)

    # Default path: output [T,B,N] spikes + final state {'mem': [B,N]}.
    spikes, state = fwd_last(inp, h_mem)
    spikes = jax.block_until_ready(spikes)
    final_mem = jax.block_until_ready(state["mem"])
    assert jnp.allclose(final_mem, ref_final, atol=1e-5), "final mem mismatch"
    # Spikes must match except (at most) where mem sits within float noise of 1.0.
    ok = (spikes.astype(jnp.float32) == ref_spikes) | (jnp.abs(ref_mems - 1.0) < 1e-4)
    assert bool(jnp.all(ok)), "spike mismatch"

    # full_state path: per-step mem log {'mem': [T,B,N]}.
    spikes_f, state_f = fwd_full(inp, h_mem)
    spikes_f = jax.block_until_ready(spikes_f)
    mem_seq = jax.block_until_ready(state_f["mem"])
    assert jnp.allclose(mem_seq, ref_mems, atol=1e-5), "mem log mismatch"
    ok_f = (spikes_f.astype(jnp.float32) == ref_spikes) | (jnp.abs(ref_mems - 1.0) < 1e-4)
    assert bool(jnp.all(ok_f)), "spike mismatch (full_state)"

    # --- padding test: N not a multiple of 128 (lane-dense padding path) ---
    SIZE2 = 96
    fwd_pad, init2 = make_sequence_no_reset_neuron(SIZE2, params)
    inp2 = jax.random.normal(kx2, (T, BATCH, SIZE2), dtype=jnp.float32) * 2.0
    h2 = jnp.broadcast_to(init2, (BATCH, SIZE2)) + \
        jax.random.normal(km2, (BATCH, SIZE2), dtype=jnp.float32)
    ref_sp2, ref_m2, ref_f2 = reference_sequence(inp2, h2, beta, factor)
    sp2, st2 = fwd_pad(inp2, h2)
    sp2 = jax.block_until_ready(sp2)
    fm2 = jax.block_until_ready(st2["mem"])
    assert sp2.shape == (T, BATCH, SIZE2) and fm2.shape == (BATCH, SIZE2)
    assert jnp.allclose(fm2, ref_f2, atol=1e-5), "final mem mismatch (padded N)"
    ok2 = (sp2.astype(jnp.float32) == ref_sp2) | (jnp.abs(ref_m2 - 1.0) < 1e-4)
    assert bool(jnp.all(ok2)), "spike mismatch (padded N)"

    print("KERNEL_OK")
</pallas_src>

<mosaic_0001>
module attributes {stable_mosaic.version = 11 : i64} {
  func.func @kernel_last(%arg0: i32, %arg1: i32, %arg2: memref<16x8x128xf32, #tpu.memory_space<vmem>>, %arg3: memref<8x128xf32, #tpu.memory_space<vmem>>, %arg4: memref<16x8x128xbf16, #tpu.memory_space<vmem>>, %arg5: memref<8x128xf32, #tpu.memory_space<vmem>>, %arg6: memref<8x128xf32, #tpu.memory_space<vmem>>) attributes {dimension_semantics = [#tpu.dimension_semantics<parallel>, #tpu.dimension_semantics<arbitrary>], iteration_bounds = array<i64: 1, 1>, scalar_prefetch = 0 : i64, scratch_operands = 1 : i64, tpu.core_type = #tpu.core_type<tc>, window_params = [{transform_indices = @transform_0, window_bounds = array<i64: 16, 8, 128>}, {transform_indices = @transform_1, window_bounds = array<i64: 8, 128>}, {transform_indices = @transform_2, window_bounds = array<i64: 16, 8, 128>}, {transform_indices = @transform_3, window_bounds = array<i64: 8, 128>}]} {
    %c0_i32 = arith.constant 0 : i32
    %0 = arith.cmpi eq, %arg1, %c0_i32 : i32
    %1 = arith.extui %0 : i1 to i32
    %c0_i32_0 = arith.constant 0 : i32
    %2 = arith.cmpi ne, %1, %c0_i32_0 : i32
    scf.if %2 {
      %c0_118 = arith.constant 0 : index
      %c0_119 = arith.constant 0 : index
      %280 = vector.load %arg3[%c0_118, %c0_119] : memref<8x128xf32, #tpu.memory_space<vmem>>, vector<8x128xf32>
      %c0_120 = arith.constant 0 : index
      %c0_121 = arith.constant 0 : index
      %281 = vector.load %arg6[%c0_120, %c0_121] : memref<8x128xf32, #tpu.memory_space<vmem>>, vector<8x128xf32>
      tpu.vector_store %arg6[%c0_120, %c0_121], %280 {strides = array<i32>} : memref<8x128xf32, #tpu.memory_space<vmem>>, vector<8x128xf32>,
    } else {
    }
    %c0 = arith.constant 0 : index
    %c0_1 = arith.constant 0 : index
    %3 = vector.load %arg6[%c0, %c0_1] : memref<8x128xf32, #tpu.memory_space<vmem>>, vector<8x128xf32>
    %c0_i32_2 = arith.constant 0 : i32
    %cst = arith.constant 0.951229453 : f32
    %4 = vector.broadcast %cst : f32 to vector<8x128xf32>
    %5 = arith.mulf %4, %3 : vector<8x128xf32>
    %6 = arith.index_cast %c0_i32_2 : i32 to index
    %c0_3 = arith.constant 0 : index
    %c0_4 = arith.constant 0 : index
    %7 = vector.load %arg2[%6, %c0_3, %c0_4] : memref<16x8x128xf32, #tpu.memory_space<vmem>>, vector<1x8x128xf32>
    %8 = vector.shape_cast %7 : vector<1x8x128xf32> to vector<8x128xf32>
    %cst_5 = arith.constant 0.308484316 : f32
    %9 = vector.broadcast %cst_5 : f32 to vector<8x128xf32>
    %10 = arith.mulf %9, %8 : vector<8x128xf32>
    %11 = arith.addf %5, %10 : vector<8x128xf32>
    %cst_6 = arith.constant 1.000000e+00 : f32
    %12 = vector.broadcast %cst_6 : f32 to vector<8x128xf32>
    %13 = arith.cmpf ogt, %11, %12 : vector<8x128xf32>
    %14 = arith.extui %13 : vector<8x128xi1> to vector<8x128xi32>
    %15 = arith.sitofp %14 : vector<8x128xi32> to vector<8x128xf32>
    %16 = arith.truncf %15 : vector<8x128xf32> to vector<8x128xbf16>
    %17 = arith.index_cast %c0_i32_2 : i32 to index
    %c0_7 = arith.constant 0 : index
    %c0_8 = arith.constant 0 : index
    %18 = vector.load %arg4[%17, %c0_7, %c0_8] : memref<16x8x128xbf16, #tpu.memory_space<vmem>>, vector<1x8x128xbf16>
    %19 = vector.shape_cast %18 : vector<1x8x128xbf16> to vector<8x128xbf16>
    %20 = vector.shape_cast %16 : vector<8x128xbf16> to vector<1x8x128xbf16>
    tpu.vector_store %arg4[%17, %c0_7, %c0_8], %20 {strides = array<i32>} : memref<16x8x128xbf16, #tpu.memory_space<vmem>>, vector<1x8x128xbf16>,
    %c1_i32 = arith.constant 1 : i32
    %cst_9 = arith.constant 0.951229453 : f32
    %21 = vector.broadcast %cst_9 : f32 to vector<8x128xf32>
    %22 = arith.mulf %21, %11 : vector<8x128xf32>
    %23 = arith.index_cast %c1_i32 : i32 to index
    %c0_10 = arith.constant 0 : index
    %c0_11 = arith.constant 0 : index
    %24 = vector.load %arg2[%23, %c0_10, %c0_11] : memref<16x8x128xf32, #tpu.memory_space<vmem>>, vector<1x8x128xf32>
    %25 = vector.shape_cast %24 : vector<1x8x128xf32> to vector<8x128xf32>
    %cst_12 = arith.constant 0.308484316 : f32
    %26 = vector.broadcast %cst_12 : f32 to vector<8x128xf32>
    %27 = arith.mulf %26, %25 : vector<8x128xf32>
    %28 = arith.addf %22, %27 : vector<8x128xf32>
    %cst_13 = arith.constant 1.000000e+00 : f32
    %29 = vector.broadcast %cst_13 : f32 to vector<8x128xf32>
    %30 = arith.cmpf ogt, %28, %29 : vector<8x128xf32>
    %31 = arith.extui %30 : vector<8x128xi1> to vector<8x128xi32>
    %32 = arith.sitofp %31 : vector<8x128xi32> to vector<8x128xf32>
    %33 = arith.truncf %32 : vector<8x128xf32> to vector<8x128xbf16>
    %34 = arith.index_cast %c1_i32 : i32 to index
    %c0_14 = arith.constant 0 : index
    %c0_15 = arith.constant 0 : index
    %35 = vector.load %arg4[%34, %c0_14, %c0_15] : memref<16x8x128xbf16, #tpu.memory_space<vmem>>, vector<1x8x128xbf16>
    %36 = vector.shape_cast %35 : vector<1x8x128xbf16> to vector<8x128xbf16>
    %37 = vector.shape_cast %33 : vector<8x128xbf16> to vector<1x8x128xbf16>
    tpu.vector_store %arg4[%34, %c0_14, %c0_15], %37 {strides = array<i32>} : memref<16x8x128xbf16, #tpu.memory_space<vmem>>, vector<1x8x128xbf16>,
    %c2_i32 = arith.constant 2 : i32
    %cst_16 = arith.constant 0.951229453 : f32
    %38 = vector.broadcast %cst_16 : f32 to vector<8x128xf32>
    %39 = arith.mulf %38, %28 : vector<8x128xf32>
    %40 = arith.index_cast %c2_i32 : i32 to index
    %c0_17 = arith.constant 0 : index
    %c0_18 = arith.constant 0 : index
    %41 = vector.load %arg2[%40, %c0_17, %c0_18] : memref<16x8x128xf32, #tpu.memory_space<vmem>>, vector<1x8x128xf32>
    %42 = vector.shape_cast %41 : vector<1x8x128xf32> to vector<8x128xf32>
    %cst_19 = arith.constant 0.308484316 : f32
    %43 = vector.broadcast %cst_19 : f32 to vector<8x128xf32>
    %44 = arith.mulf %43, %42 : vector<8x128xf32>
    %45 = arith.addf %39, %44 : vector<8x128xf32>
    %cst_20 = arith.constant 1.000000e+00 : f32
    %46 = vector.broadcast %cst_20 : f32 to vector<8x128xf32>
    %47 = arith.cmpf ogt, %45, %46 : vector<8x128xf32>
    %48 = arith.extui %47 : vector<8x128xi1> to vector<8x128xi32>
    %49 = arith.sitofp %48 : vector<8x128xi32> to vector<8x128xf32>
    %50 = arith.truncf %49 : vector<8x128xf32> to vector<8x128xbf16>
    %51 = arith.index_cast %c2_i32 : i32 to index
    %c0_21 = arith.constant 0 : index
    %c0_22 = arith.constant 0 : index
    %52 = vector.load %arg4[%51, %c0_21, %c0_22] : memref<16x8x128xbf16, #tpu.memory_space<vmem>>, vector<1x8x128xbf16>
    %53 = vector.shape_cast %52 : vector<1x8x128xbf16> to vector<8x128xbf16>
    %54 = vector.shape_cast %50 : vector<8x128xbf16> to vector<1x8x128xbf16>
    tpu.vector_store %arg4[%51, %c0_21, %c0_22], %54 {strides = array<i32>} : memref<16x8x128xbf16, #tpu.memory_space<vmem>>, vector<1x8x128xbf16>,
    %c3_i32 = arith.constant 3 : i32
    %cst_23 = arith.constant 0.951229453 : f32
    %55 = vector.broadcast %cst_23 : f32 to vector<8x128xf32>
    %56 = arith.mulf %55, %45 : vector<8x128xf32>
    %57 = arith.index_cast %c3_i32 : i32 to index
    %c0_24 = arith.constant 0 : index
    %c0_25 = arith.constant 0 : index
    %58 = vector.load %arg2[%57, %c0_24, %c0_25] : memref<16x8x128xf32, #tpu.memory_space<vmem>>, vector<1x8x128xf32>
    %59 = vector.shape_cast %58 : vector<1x8x128xf32> to vector<8x128xf32>
    %cst_26 = arith.constant 0.308484316 : f32
    %60 = vector.broadcast %cst_26 : f32 to vector<8x128xf32>
    %61 = arith.mulf %60, %59 : vector<8x128xf32>
    %62 = arith.addf %56, %61 : vector<8x128xf32>
    %cst_27 = arith.constant 1.000000e+00 : f32
    %63 = vector.broadcast %cst_27 : f32 to vector<8x128xf32>
    %64 = arith.cmpf ogt, %62, %63 : vector<8x128xf32>
    %65 = arith.extui %64 : vector<8x128xi1> to vector<8x128xi32>
    %66 = arith.sitofp %65 : vector<8x128xi32> to vector<8x128xf32>
    %67 = arith.truncf %66 : vector<8x128xf32> to vector<8x128xbf16>
    %68 = arith.index_cast %c3_i32 : i32 to index
    %c0_28 = arith.constant 0 : index
    %c0_29 = arith.constant 0 : index
    %69 = vector.load %arg4[%68, %c0_28, %c0_29] : memref<16x8x128xbf16, #tpu.memory_space<vmem>>, vector<1x8x128xbf16>
    %70 = vector.shape_cast %69 : vector<1x8x128xbf16> to vector<8x128xbf16>
    %71 = vector.shape_cast %67 : vector<8x128xbf16> to vector<1x8x128xbf16>
    tpu.vector_store %arg4[%68, %c0_28, %c0_29], %71 {strides = array<i32>} : memref<16x8x128xbf16, #tpu.memory_space<vmem>>, vector<1x8x128xbf16>,
    %c4_i32 = arith.constant 4 : i32
    %cst_30 = arith.constant 0.951229453 : f32
    %72 = vector.broadcast %cst_30 : f32 to vector<8x128xf32>
    %73 = arith.mulf %72, %62 : vector<8x128xf32>
    %74 = arith.index_cast %c4_i32 : i32 to index
    %c0_31 = arith.constant 0 : index
    %c0_32 = arith.constant 0 : index
    %75 = vector.load %arg2[%74, %c0_31, %c0_32] : memref<16x8x128xf32, #tpu.memory_space<vmem>>, vector<1x8x128xf32>
    %76 = vector.shape_cast %75 : vector<1x8x128xf32> to vector<8x128xf32>
    %cst_33 = arith.constant 0.308484316 : f32
    %77 = vector.broadcast %cst_33 : f32 to vector<8x128xf32>
    %78 = arith.mulf %77, %76 : vector<8x128xf32>
    %79 = arith.addf %73, %78 : vector<8x128xf32>
    %cst_34 = arith.constant 1.000000e+00 : f32
    %80 = vector.broadcast %cst_34 : f32 to vector<8x128xf32>
    %81 = arith.cmpf ogt, %79, %80 : vector<8x128xf32>
    %82 = arith.extui %81 : vector<8x128xi1> to vector<8x128xi32>
    %83 = arith.sitofp %82 : vector<8x128xi32> to vector<8x128xf32>
    %84 = arith.truncf %83 : vector<8x128xf32> to vector<8x128xbf16>
    %85 = arith.index_cast %c4_i32 : i32 to index
    %c0_35 = arith.constant 0 : index
    %c0_36 = arith.constant 0 : index
    %86 = vector.load %arg4[%85, %c0_35, %c0_36] : memref<16x8x128xbf16, #tpu.memory_space<vmem>>, vector<1x8x128xbf16>
    %87 = vector.shape_cast %86 : vector<1x8x128xbf16> to vector<8x128xbf16>
    %88 = vector.shape_cast %84 : vector<8x128xbf16> to vector<1x8x128xbf16>
    tpu.vector_store %arg4[%85, %c0_35, %c0_36], %88 {strides = array<i32>} : memref<16x8x128xbf16, #tpu.memory_space<vmem>>, vector<1x8x128xbf16>,
    %c5_i32 = arith.constant 5 : i32
    %cst_37 = arith.constant 0.951229453 : f32
    %89 = vector.broadcast %cst_37 : f32 to vector<8x128xf32>
    %90 = arith.mulf %89, %79 : vector<8x128xf32>
    %91 = arith.index_cast %c5_i32 : i32 to index
    %c0_38 = arith.constant 0 : index
    %c0_39 = arith.constant 0 : index
    %92 = vector.load %arg2[%91, %c0_38, %c0_39] : memref<16x8x128xf32, #tpu.memory_space<vmem>>, vector<1x8x128xf32>
    %93 = vector.shape_cast %92 : vector<1x8x128xf32> to vector<8x128xf32>
    %cst_40 = arith.constant 0.308484316 : f32
    %94 = vector.broadcast %cst_40 : f32 to vector<8x128xf32>
    %95 = arith.mulf %94, %93 : vector<8x128xf32>
    %96 = arith.addf %90, %95 : vector<8x128xf32>
    %cst_41 = arith.constant 1.000000e+00 : f32
    %97 = vector.broadcast %cst_41 : f32 to vector<8x128xf32>
    %98 = arith.cmpf ogt, %96, %97 : vector<8x128xf32>
    %99 = arith.extui %98 : vector<8x128xi1> to vector<8x128xi32>
    %100 = arith.sitofp %99 : vector<8x128xi32> to vector<8x128xf32>
    %101 = arith.truncf %100 : vector<8x128xf32> to vector<8x128xbf16>
    %102 = arith.index_cast %c5_i32 : i32 to index
    %c0_42 = arith.constant 0 : index
    %c0_43 = arith.constant 0 : index
    %103 = vector.load %arg4[%102, %c0_42, %c0_43] : memref<16x8x128xbf16, #tpu.memory_space<vmem>>, vector<1x8x128xbf16>
    %104 = vector.shape_cast %103 : vector<1x8x128xbf16> to vector<8x128xbf16>
    %105 = vector.shape_cast %101 : vector<8x128xbf16> to vector<1x8x128xbf16>
    tpu.vector_store %arg4[%102, %c0_42, %c0_43], %105 {strides = array<i32>} : memref<16x8x128xbf16, #tpu.memory_space<vmem>>, vector<1x8x128xbf16>,
    %c6_i32 = arith.constant 6 : i32
    %cst_44 = arith.constant 0.951229453 : f32
    %106 = vector.broadcast %cst_44 : f32 to vector<8x128xf32>
    %107 = arith.mulf %106, %96 : vector<8x128xf32>
    %108 = arith.index_cast %c6_i32 : i32 to index
    %c0_45 = arith.constant 0 : index
    %c0_46 = arith.constant 0 : index
    %109 = vector.load %arg2[%108, %c0_45, %c0_46] : memref<16x8x128xf32, #tpu.memory_space<vmem>>, vector<1x8x128xf32>
    %110 = vector.shape_cast %109 : vector<1x8x128xf32> to vector<8x128xf32>
    %cst_47 = arith.constant 0.308484316 : f32
    %111 = vector.broadcast %cst_47 : f32 to vector<8x128xf32>
    %112 = arith.mulf %111, %110 : vector<8x128xf32>
    %113 = arith.addf %107, %112 : vector<8x128xf32>
    %cst_48 = arith.constant 1.000000e+00 : f32
    %114 = vector.broadcast %cst_48 : f32 to vector<8x128xf32>
    %115 = arith.cmpf ogt, %113, %114 : vector<8x128xf32>
    %116 = arith.extui %115 : vector<8x128xi1> to vector<8x128xi32>
    %117 = arith.sitofp %116 : vector<8x128xi32> to vector<8x128xf32>
    %118 = arith.truncf %117 : vector<8x128xf32> to vector<8x128xbf16>
    %119 = arith.index_cast %c6_i32 : i32 to index
    %c0_49 = arith.constant 0 : index
    %c0_50 = arith.constant 0 : index
    %120 = vector.load %arg4[%119, %c0_49, %c0_50] : memref<16x8x128xbf16, #tpu.memory_space<vmem>>, vector<1x8x128xbf16>
    %121 = vector.shape_cast %120 : vector<1x8x128xbf16> to vector<8x128xbf16>
    %122 = vector.shape_cast %118 : vector<8x128xbf16> to vector<1x8x128xbf16>
    tpu.vector_store %arg4[%119, %c0_49, %c0_50], %122 {strides = array<i32>} : memref<16x8x128xbf16, #tpu.memory_space<vmem>>, vector<1x8x128xbf16>,
    %c7_i32 = arith.constant 7 : i32
    %cst_51 = arith.constant 0.951229453 : f32
    %123 = vector.broadcast %cst_51 : f32 to vector<8x128xf32>
    %124 = arith.mulf %123, %113 : vector<8x128xf32>
    %125 = arith.index_cast %c7_i32 : i32 to index
    %c0_52 = arith.constant 0 : index
    %c0_53 = arith.constant 0 : index
    %126 = vector.load %arg2[%125, %c0_52, %c0_53] : memref<16x8x128xf32, #tpu.memory_space<vmem>>, vector<1x8x128xf32>
    %127 = vector.shape_cast %126 : vector<1x8x128xf32> to vector<8x128xf32>
    %cst_54 = arith.constant 0.308484316 : f32
    %128 = vector.broadcast %cst_54 : f32 to vector<8x128xf32>
    %129 = arith.mulf %128, %127 : vector<8x128xf32>
    %130 = arith.addf %124, %129 : vector<8x128xf32>
    %cst_55 = arith.constant 1.000000e+00 : f32
    %131 = vector.broadcast %cst_55 : f32 to vector<8x128xf32>
    %132 = arith.cmpf ogt, %130, %131 : vector<8x128xf32>
    %133 = arith.extui %132 : vector<8x128xi1> to vector<8x128xi32>
    %134 = arith.sitofp %133 : vector<8x128xi32> to vector<8x128xf32>
    %135 = arith.truncf %134 : vector<8x128xf32> to vector<8x128xbf16>
    %136 = arith.index_cast %c7_i32 : i32 to index
    %c0_56 = arith.constant 0 : index
    %c0_57 = arith.constant 0 : index
    %137 = vector.load %arg4[%136, %c0_56, %c0_57] : memref<16x8x128xbf16, #tpu.memory_space<vmem>>, vector<1x8x128xbf16>
    %138 = vector.shape_cast %137 : vector<1x8x128xbf16> to vector<8x128xbf16>
    %139 = vector.shape_cast %135 : vector<8x128xbf16> to vector<1x8x128xbf16>
    tpu.vector_store %arg4[%136, %c0_56, %c0_57], %139 {strides = array<i32>} : memref<16x8x128xbf16, #tpu.memory_space<vmem>>, vector<1x8x128xbf16>,
    %c8_i32 = arith.constant 8 : i32
    %cst_58 = arith.constant 0.951229453 : f32
    %140 = vector.broadcast %cst_58 : f32 to vector<8x128xf32>
    %141 = arith.mulf %140, %130 : vector<8x128xf32>
    %142 = arith.index_cast %c8_i32 : i32 to index
    %c0_59 = arith.constant 0 : index
    %c0_60 = arith.constant 0 : index
    %143 = vector.load %arg2[%142, %c0_59, %c0_60] : memref<16x8x128xf32, #tpu.memory_space<vmem>>, vector<1x8x128xf32>
    %144 = vector.shape_cast %143 : vector<1x8x128xf32> to vector<8x128xf32>
    %cst_61 = arith.constant 0.308484316 : f32
    %145 = vector.broadcast %cst_61 : f32 to vector<8x128xf32>
    %146 = arith.mulf %145, %144 : vector<8x128xf32>
    %147 = arith.addf %141, %146 : vector<8x128xf32>
    %cst_62 = arith.constant 1.000000e+00 : f32
    %148 = vector.broadcast %cst_62 : f32 to vector<8x128xf32>
    %149 = arith.cmpf ogt, %147, %148 : vector<8x128xf32>
    %150 = arith.extui %149 : vector<8x128xi1> to vector<8x128xi32>
    %151 = arith.sitofp %150 : vector<8x128xi32> to vector<8x128xf32>
    %152 = arith.truncf %151 : vector<8x128xf32> to vector<8x128xbf16>
    %153 = arith.index_cast %c8_i32 : i32 to index
    %c0_63 = arith.constant 0 : index
    %c0_64 = arith.constant 0 : index
    %154 = vector.load %arg4[%153, %c0_63, %c0_64] : memref<16x8x128xbf16, #tpu.memory_space<vmem>>, vector<1x8x128xbf16>
    %155 = vector.shape_cast %154 : vector<1x8x128xbf16> to vector<8x128xbf16>
    %156 = vector.shape_cast %152 : vector<8x128xbf16> to vector<1x8x128xbf16>
    tpu.vector_store %arg4[%153, %c0_63, %c0_64], %156 {strides = array<i32>} : memref<16x8x128xbf16, #tpu.memory_space<vmem>>, vector<1x8x128xbf16>,
    %c9_i32 = arith.constant 9 : i32
    %cst_65 = arith.constant 0.951229453 : f32
    %157 = vector.broadcast %cst_65 : f32 to vector<8x128xf32>
    %158 = arith.mulf %157, %147 : vector<8x128xf32>
    %159 = arith.index_cast %c9_i32 : i32 to index
    %c0_66 = arith.constant 0 : index
    %c0_67 = arith.constant 0 : index
    %160 = vector.load %arg2[%159, %c0_66, %c0_67] : memref<16x8x128xf32, #tpu.memory_space<vmem>>, vector<1x8x128xf32>
    %161 = vector.shape_cast %160 : vector<1x8x128xf32> to vector<8x128xf32>
    %cst_68 = arith.constant 0.308484316 : f32
    %162 = vector.broadcast %cst_68 : f32 to vector<8x128xf32>
    %163 = arith.mulf %162, %161 : vector<8x128xf32>
    %164 = arith.addf %158, %163 : vector<8x128xf32>
    %cst_69 = arith.constant 1.000000e+00 : f32
    %165 = vector.broadcast %cst_69 : f32 to vector<8x128xf32>
    %166 = arith.cmpf ogt, %164, %165 : vector<8x128xf32>
    %167 = arith.extui %166 : vector<8x128xi1> to vector<8x128xi32>
    %168 = arith.sitofp %167 : vector<8x128xi32> to vector<8x128xf32>
    %169 = arith.truncf %168 : vector<8x128xf32> to vector<8x128xbf16>
    %170 = arith.index_cast %c9_i32 : i32 to index
    %c0_70 = arith.constant 0 : index
    %c0_71 = arith.constant 0 : index
    %171 = vector.load %arg4[%170, %c0_70, %c0_71] : memref<16x8x128xbf16, #tpu.memory_space<vmem>>, vector<1x8x128xbf16>
    %172 = vector.shape_cast %171 : vector<1x8x128xbf16> to vector<8x128xbf16>
    %173 = vector.shape_cast %169 : vector<8x128xbf16> to vector<1x8x128xbf16>
    tpu.vector_store %arg4[%170, %c0_70, %c0_71], %173 {strides = array<i32>} : memref<16x8x128xbf16, #tpu.memory_space<vmem>>, vector<1x8x128xbf16>,
    %c10_i32 = arith.constant 10 : i32
    %cst_72 = arith.constant 0.951229453 : f32
    %174 = vector.broadcast %cst_72 : f32 to vector<8x128xf32>
    %175 = arith.mulf %174, %164 : vector<8x128xf32>
    %176 = arith.index_cast %c10_i32 : i32 to index
    %c0_73 = arith.constant 0 : index
    %c0_74 = arith.constant 0 : index
    %177 = vector.load %arg2[%176, %c0_73, %c0_74] : memref<16x8x128xf32, #tpu.memory_space<vmem>>, vector<1x8x128xf32>
    %178 = vector.shape_cast %177 : vector<1x8x128xf32> to vector<8x128xf32>
    %cst_75 = arith.constant 0.308484316 : f32
    %179 = vector.broadcast %cst_75 : f32 to vector<8x128xf32>
    %180 = arith.mulf %179, %178 : vector<8x128xf32>
    %181 = arith.addf %175, %180 : vector<8x128xf32>
    %cst_76 = arith.constant 1.000000e+00 : f32
    %182 = vector.broadcast %cst_76 : f32 to vector<8x128xf32>
    %183 = arith.cmpf ogt, %181, %182 : vector<8x128xf32>
    %184 = arith.extui %183 : vector<8x128xi1> to vector<8x128xi32>
    %185 = arith.sitofp %184 : vector<8x128xi32> to vector<8x128xf32>
    %186 = arith.truncf %185 : vector<8x128xf32> to vector<8x128xbf16>
    %187 = arith.index_cast %c10_i32 : i32 to index
    %c0_77 = arith.constant 0 : index
    %c0_78 = arith.constant 0 : index
    %188 = vector.load %arg4[%187, %c0_77, %c0_78] : memref<16x8x128xbf16, #tpu.memory_space<vmem>>, vector<1x8x128xbf16>
    %189 = vector.shape_cast %188 : vector<1x8x128xbf16> to vector<8x128xbf16>
    %190 = vector.shape_cast %186 : vector<8x128xbf16> to vector<1x8x128xbf16>
    tpu.vector_store %arg4[%187, %c0_77, %c0_78], %190 {strides = array<i32>} : memref<16x8x128xbf16, #tpu.memory_space<vmem>>, vector<1x8x128xbf16>,
    %c11_i32 = arith.constant 11 : i32
    %cst_79 = arith.constant 0.951229453 : f32
    %191 = vector.broadcast %cst_79 : f32 to vector<8x128xf32>
    %192 = arith.mulf %191, %181 : vector<8x128xf32>
    %193 = arith.index_cast %c11_i32 : i32 to index
    %c0_80 = arith.constant 0 : index
    %c0_81 = arith.constant 0 : index
    %194 = vector.load %arg2[%193, %c0_80, %c0_81] : memref<16x8x128xf32, #tpu.memory_space<vmem>>, vector<1x8x128xf32>
    %195 = vector.shape_cast %194 : vector<1x8x128xf32> to vector<8x128xf32>
    %cst_82 = arith.constant 0.308484316 : f32
    %196 = vector.broadcast %cst_82 : f32 to vector<8x128xf32>
    %197 = arith.mulf %196, %195 : vector<8x128xf32>
    %198 = arith.addf %192, %197 : vector<8x128xf32>
    %cst_83 = arith.constant 1.000000e+00 : f32
    %199 = vector.broadcast %cst_83 : f32 to vector<8x128xf32>
    %200 = arith.cmpf ogt, %198, %199 : vector<8x128xf32>
    %201 = arith.extui %200 : vector<8x128xi1> to vector<8x128xi32>
    %202 = arith.sitofp %201 : vector<8x128xi32> to vector<8x128xf32>
    %203 = arith.truncf %202 : vector<8x128xf32> to vector<8x128xbf16>
    %204 = arith.index_cast %c11_i32 : i32 to index
    %c0_84 = arith.constant 0 : index
    %c0_85 = arith.constant 0 : index
    %205 = vector.load %arg4[%204, %c0_84, %c0_85] : memref<16x8x128xbf16, #tpu.memory_space<vmem>>, vector<1x8x128xbf16>
    %206 = vector.shape_cast %205 : vector<1x8x128xbf16> to vector<8x128xbf16>
    %207 = vector.shape_cast %203 : vector<8x128xbf16> to vector<1x8x128xbf16>
    tpu.vector_store %arg4[%204, %c0_84, %c0_85], %207 {strides = array<i32>} : memref<16x8x128xbf16, #tpu.memory_space<vmem>>, vector<1x8x128xbf16>,
    %c12_i32 = arith.constant 12 : i32
    %cst_86 = arith.constant 0.951229453 : f32
    %208 = vector.broadcast %cst_86 : f32 to vector<8x128xf32>
    %209 = arith.mulf %208, %198 : vector<8x128xf32>
    %210 = arith.index_cast %c12_i32 : i32 to index
    %c0_87 = arith.constant 0 : index
    %c0_88 = arith.constant 0 : index
    %211 = vector.load %arg2[%210, %c0_87, %c0_88] : memref<16x8x128xf32, #tpu.memory_space<vmem>>, vector<1x8x128xf32>
    %212 = vector.shape_cast %211 : vector<1x8x128xf32> to vector<8x128xf32>
    %cst_89 = arith.constant 0.308484316 : f32
    %213 = vector.broadcast %cst_89 : f32 to vector<8x128xf32>
    %214 = arith.mulf %213, %212 : vector<8x128xf32>
    %215 = arith.addf %209, %214 : vector<8x128xf32>
    %cst_90 = arith.constant 1.000000e+00 : f32
    %216 = vector.broadcast %cst_90 : f32 to vector<8x128xf32>
    %217 = arith.cmpf ogt, %215, %216 : vector<8x128xf32>
    %218 = arith.extui %217 : vector<8x128xi1> to vector<8x128xi32>
    %219 = arith.sitofp %218 : vector<8x128xi32> to vector<8x128xf32>
    %220 = arith.truncf %219 : vector<8x128xf32> to vector<8x128xbf16>
    %221 = arith.index_cast %c12_i32 : i32 to index
    %c0_91 = arith.constant 0 : index
    %c0_92 = arith.constant 0 : index
    %222 = vector.load %arg4[%221, %c0_91, %c0_92] : memref<16x8x128xbf16, #tpu.memory_space<vmem>>, vector<1x8x128xbf16>
    %223 = vector.shape_cast %222 : vector<1x8x128xbf16> to vector<8x128xbf16>
    %224 = vector.shape_cast %220 : vector<8x128xbf16> to vector<1x8x128xbf16>
    tpu.vector_store %arg4[%221, %c0_91, %c0_92], %224 {strides = array<i32>} : memref<16x8x128xbf16, #tpu.memory_space<vmem>>, vector<1x8x128xbf16>,
    %c13_i32 = arith.constant 13 : i32
    %cst_93 = arith.constant 0.951229453 : f32
    %225 = vector.broadcast %cst_93 : f32 to vector<8x128xf32>
    %226 = arith.mulf %225, %215 : vector<8x128xf32>
    %227 = arith.index_cast %c13_i32 : i32 to index
    %c0_94 = arith.constant 0 : index
    %c0_95 = arith.constant 0 : index
    %228 = vector.load %arg2[%227, %c0_94, %c0_95] : memref<16x8x128xf32, #tpu.memory_space<vmem>>, vector<1x8x128xf32>
    %229 = vector.shape_cast %228 : vector<1x8x128xf32> to vector<8x128xf32>
    %cst_96 = arith.constant 0.308484316 : f32
    %230 = vector.broadcast %cst_96 : f32 to vector<8x128xf32>
    %231 = arith.mulf %230, %229 : vector<8x128xf32>
    %232 = arith.addf %226, %231 : vector<8x128xf32>
    %cst_97 = arith.constant 1.000000e+00 : f32
    %233 = vector.broadcast %cst_97 : f32 to vector<8x128xf32>
    %234 = arith.cmpf ogt, %232, %233 : vector<8x128xf32>
    %235 = arith.extui %234 : vector<8x128xi1> to vector<8x128xi32>
    %236 = arith.sitofp %235 : vector<8x128xi32> to vector<8x128xf32>
    %237 = arith.truncf %236 : vector<8x128xf32> to vector<8x128xbf16>
    %238 = arith.index_cast %c13_i32 : i32 to index
    %c0_98 = arith.constant 0 : index
    %c0_99 = arith.constant 0 : index
    %239 = vector.load %arg4[%238, %c0_98, %c0_99] : memref<16x8x128xbf16, #tpu.memory_space<vmem>>, vector<1x8x128xbf16>
    %240 = vector.shape_cast %239 : vector<1x8x128xbf16> to vector<8x128xbf16>
    %241 = vector.shape_cast %237 : vector<8x128xbf16> to vector<1x8x128xbf16>
    tpu.vector_store %arg4[%238, %c0_98, %c0_99], %241 {strides = array<i32>} : memref<16x8x128xbf16, #tpu.memory_space<vmem>>, vector<1x8x128xbf16>,
    %c14_i32 = arith.constant 14 : i32
    %cst_100 = arith.constant 0.951229453 : f32
    %242 = vector.broadcast %cst_100 : f32 to vector<8x128xf32>
    %243 = arith.mulf %242, %232 : vector<8x128xf32>
    %244 = arith.index_cast %c14_i32 : i32 to index
    %c0_101 = arith.constant 0 : index
    %c0_102 = arith.constant 0 : index
    %245 = vector.load %arg2[%244, %c0_101, %c0_102] : memref<16x8x128xf32, #tpu.memory_space<vmem>>, vector<1x8x128xf32>
    %246 = vector.shape_cast %245 : vector<1x8x128xf32> to vector<8x128xf32>
    %cst_103 = arith.constant 0.308484316 : f32
    %247 = vector.broadcast %cst_103 : f32 to vector<8x128xf32>
    %248 = arith.mulf %247, %246 : vector<8x128xf32>
    %249 = arith.addf %243, %248 : vector<8x128xf32>
    %cst_104 = arith.constant 1.000000e+00 : f32
    %250 = vector.broadcast %cst_104 : f32 to vector<8x128xf32>
    %251 = arith.cmpf ogt, %249, %250 : vector<8x128xf32>
    %252 = arith.extui %251 : vector<8x128xi1> to vector<8x128xi32>
    %253 = arith.sitofp %252 : vector<8x128xi32> to vector<8x128xf32>
    %254 = arith.truncf %253 : vector<8x128xf32> to vector<8x128xbf16>
    %255 = arith.index_cast %c14_i32 : i32 to index
    %c0_105 = arith.constant 0 : index
    %c0_106 = arith.constant 0 : index
    %256 = vector.load %arg4[%255, %c0_105, %c0_106] : memref<16x8x128xbf16, #tpu.memory_space<vmem>>, vector<1x8x128xbf16>
    %257 = vector.shape_cast %256 : vector<1x8x128xbf16> to vector<8x128xbf16>
    %258 = vector.shape_cast %254 : vector<8x128xbf16> to vector<1x8x128xbf16>
    tpu.vector_store %arg4[%255, %c0_105, %c0_106], %258 {strides = array<i32>} : memref<16x8x128xbf16, #tpu.memory_space<vmem>>, vector<1x8x128xbf16>,
    %c15_i32 = arith.constant 15 : i32
    %cst_107 = arith.constant 0.951229453 : f32
    %259 = vector.broadcast %cst_107 : f32 to vector<8x128xf32>
    %260 = arith.mulf %259, %249 : vector<8x128xf32>
    %261 = arith.index_cast %c15_i32 : i32 to index
    %c0_108 = arith.constant 0 : index
    %c0_109 = arith.constant 0 : index
    %262 = vector.load %arg2[%261, %c0_108, %c0_109] : memref<16x8x128xf32, #tpu.memory_space<vmem>>, vector<1x8x128xf32>
    %263 = vector.shape_cast %262 : vector<1x8x128xf32> to vector<8x128xf32>
    %cst_110 = arith.constant 0.308484316 : f32
    %264 = vector.broadcast %cst_110 : f32 to vector<8x128xf32>
    %265 = arith.mulf %264, %263 : vector<8x128xf32>
    %266 = arith.addf %260, %265 : vector<8x128xf32>
    %cst_111 = arith.constant 1.000000e+00 : f32
    %267 = vector.broadcast %cst_111 : f32 to vector<8x128xf32>
    %268 = arith.cmpf ogt, %266, %267 : vector<8x128xf32>
    %269 = arith.extui %268 : vector<8x128xi1> to vector<8x128xi32>
    %270 = arith.sitofp %269 : vector<8x128xi32> to vector<8x128xf32>
    %271 = arith.truncf %270 : vector<8x128xf32> to vector<8x128xbf16>
    %272 = arith.index_cast %c15_i32 : i32 to index
    %c0_112 = arith.constant 0 : index
    %c0_113 = arith.constant 0 : index
    %273 = vector.load %arg4[%272, %c0_112, %c0_113] : memref<16x8x128xbf16, #tpu.memory_space<vmem>>, vector<1x8x128xbf16>
    %274 = vector.shape_cast %273 : vector<1x8x128xbf16> to vector<8x128xbf16>
    %275 = vector.shape_cast %271 : vector<8x128xbf16> to vector<1x8x128xbf16>
    tpu.vector_store %arg4[%272, %c0_112, %c0_113], %275 {strides = array<i32>} : memref<16x8x128xbf16, #tpu.memory_space<vmem>>, vector<1x8x128xbf16>,
    %c16_i32 = arith.constant 16 : i32
    %c0_114 = arith.constant 0 : index
    %c0_115 = arith.constant 0 : index
    %276 = vector.load %arg6[%c0_114, %c0_115] : memref<8x128xf32, #tpu.memory_space<vmem>>, vector<8x128xf32>
    tpu.vector_store %arg6[%c0_114, %c0_115], %266 {strides = array<i32>} : memref<8x128xf32, #tpu.memory_space<vmem>>, vector<8x128xf32>,
    %c0_i32_116 = arith.constant 0 : i32
    %277 = arith.cmpi eq, %arg1, %c0_i32_116 : i32
    %278 = arith.extui %277 : i1 to i32
    %c0_i32_117 = arith.constant 0 : i32
    %279 = arith.cmpi ne, %278, %c0_i32_117 : i32
    scf.if %279 {
      %c0_118 = arith.constant 0 : index
      %c0_119 = arith.constant 0 : index
      %280 = vector.load %arg5[%c0_118, %c0_119] : memref<8x128xf32, #tpu.memory_space<vmem>>, vector<8x128xf32>
      tpu.vector_store %arg5[%c0_118, %c0_119], %266 {strides = array<i32>} : memref<8x128xf32, #tpu.memory_space<vmem>>, vector<8x128xf32>,
    } else {
    }
    return
  }
  func.func @transform_0(%arg0: i32, %arg1: i32) -> (i32, i32, i32) {
    %c0_i32 = arith.constant 0 : i32
    %c0_i32_0 = arith.constant 0 : i32
    return %arg1, %arg0, %c0_i32 : i32, i32, i32
  }
  func.func @transform_1(%arg0: i32, %arg1: i32) -> (i32, i32) {
    %c0_i32 = arith.constant 0 : i32
    %c0_i32_0 = arith.constant 0 : i32
    return %arg0, %c0_i32 : i32, i32
  }
  func.func @transform_2(%arg0: i32, %arg1: i32) -> (i32, i32, i32) {
    %c0_i32 = arith.constant 0 : i32
    %c0_i32_0 = arith.constant 0 : i32
    return %arg1, %arg0, %c0_i32 : i32, i32, i32
  }
  func.func @transform_3(%arg0: i32, %arg1: i32) -> (i32, i32) {
    %c0_i32 = arith.constant 0 : i32
    %c0_i32_0 = arith.constant 0 : i32
    return %arg0, %c0_i32 : i32, i32
  }
}

</mosaic_0001>

<bundles_post_ra>
// kernel: forward.1
= control target key start
LH: loop header
LB: loop body
LE: loop exit
PB: predicated region body
PF: predicated region fallthrough
CT: control target
= control target key end

     0   :  { %9 = vsyncpa [#allocation4], 0  ;;  %s453_s0 = inlined_call_operand.hbm [shape: f32[16,8,128], index: 0, kind: input, shape index: {}]   ;;  %s454_s1 = inlined_call_operand.hbm [shape: f32[8,128], index: 1, kind: input, shape index: {}]   ;;  %s455_s2 = inlined_call_operand.hbm [shape: bf16[16,8,128], index: 2, kind: output, shape index: {0}]   ;;  %s456_s3 = inlined_call_operand.hbm [shape: f32[8,128], index: 3, kind: output, shape index: {1}]  }
   0x1   :  { %10 = vsyncpa [#allocation7], 0 }
   0x2   :  { %11 = vsyncpa [#allocation5], 0 }
   0x3   :  { %12 = vsyncpa [#allocation10], 0  ;;  %s17_s14 = sshll.u32 %s453_s0, 4  ;;  %s396_s15 = smov [#allocation3]   ;;  %s18_s14 = int_to_ptr.hbm [resolvable:$true] %s17_s14 }
   0x4   :  { %s19_s16 = sshll.u32 %s396_s15, 4  ;;  %s31_s19 = sshll.u32 %s454_s1, 4  ;;  %s20_s16 = int_to_ptr.vmem [resolvable:$true] %s19_s16  ;;  %s32_s19 = int_to_ptr.hbm [resolvable:$true] %s31_s19 }
   0x5   :  { %s397_s20 = smov 128   ;;  %s398_s21 = smov 8  }
   0x6   :  { %25 = dma.hbm_to_vmem [thread:$0]  %s18_s14, 2048, %s20_s16, [#allocation4], %s397_s20, %s397_s20, %s398_s21  }
   0x7   :  { %s399_s22 = smov [#allocation6]  }
   0x8   :  { %s33_s23 = sshll.u32 %s399_s22, 4  ;;  %s34_s23 = int_to_ptr.vmem [resolvable:$true] %s33_s23 }
   0x9   :  { %36 = dma.hbm_to_vmem [thread:$0]  %s32_s19, 128, %s34_s23, [#allocation7]  }
   0xa   :  { %388 = dma.done.wait [#allocation4], 2048  }
   0xb   :  { %389 = vsyncadd [#allocation4], 4294965248 }
   0xc   :  { %390 = dma.done.wait [#allocation7], 128  }
   0xd   :  { %391 = vsyncadd [#allocation7], 4294967168  ;;  %v49_v0 = vld [vmem:[#allocation6] sm:$0xff]  ;;  %v63_v2 = vld [vmem:[#allocation3 + $0x8] sm:$0xff]  ;;  %v400_v9 = vmov 0.0   ;;  %s401_s0 = smov [#allocation9]  }
   0xe   :  { %v53_v1 = vld [vmem:[#allocation3] sm:$0xff]  ;;  %v52_v3 = vmul.f32 0.95122945, %v49_v0  ;;  %v64_v6 = vmul.f32 0.30848432, %v63_v2  ;;  %v74_v7 = vld [vmem:[#allocation3 + $0x10] sm:$0xff] }
   0xf   :  { %v54_v4 = vmul.f32 0.30848432, %v53_v1  ;;  %v75_v13 = vmul.f32 0.30848432, %v74_v7  ;;  %v85_v14 = vld [vmem:[#allocation3 + $0x18] sm:$0xff]  ;;  %v96_v20 = vld [vmem:[#allocation3 + $0x20] sm:$0xff] }
  0x10   :  { %v86_v19 = vmul.f32 0.30848432, %v85_v14  ;;  %v97_v25 = vmul.f32 0.30848432, %v96_v20  ;;  %v107_v26 = vld [vmem:[#allocation3 + $0x28] sm:$0xff]  ;;  %v118_v32 = vld [vmem:[#allocation3 + $0x30] sm:$0xff] }
  0x11   :  { %v55_v5 = vadd.f32 %v54_v4, %v52_v3  ;;  %v108_v31 = vmul.f32 0.30848432, %v107_v26  ;;  %v119_v37 = vmul.f32 0.30848432, %v118_v32  ;;  %v129_v38 = vld [vmem:[#allocation3 + $0x38] sm:$0xff]  ;;  %v140_v44 = vld [vmem:[#allocation3 + $0x40] sm:$0xff] }
  0x12   :  { %v130_v43 = vmul.f32 0.30848432, %v129_v38  ;;  %v141_v49 = vmul.f32 0.30848432, %v140_v44  ;;  %v151_v50 = vld [vmem:[#allocation3 + $0x48] sm:$0xff]  ;;  %v162_v56 = vld [vmem:[#allocation3 + $0x50] sm:$0xff] }
  0x13   :  { %vm56_vm0 = vcmp.gt.f32.partialorder %v55_v5, 1.0  ;;  %v61_v8 = vmul.f32 0.95122945, %v55_v5  ;;  %v152_v55 = vmul.f32 0.30848432, %v151_v50  ;;  %v173_v62 = vld [vmem:[#allocation3 + $0x58] sm:$0xff] }
  0x14   :  { %v267_v10 = vsel %vm56_vm0, 1.0, %v400_v9  ;;  %v163_v61 = vmul.f32 0.30848432, %v162_v56  ;;  %v174_v3 = vmul.f32 0.30848432, %v173_v62  ;;  %v184_v4 = vld [vmem:[#allocation3 + $0x60] sm:$0xff] }
  0x15   :  { %v59_v11 = vpack.c.bf16 %v267_v10, %v267_v10  ;;  %v65_v12 = vadd.f32 %v64_v6, %v61_v8  ;;  %v185_v10 = vmul.f32 0.30848432, %v184_v4  ;;  %s249_s1 = sshll.u32 %s401_s0, 4  ;;  %s251_s26 = sshll.u32 %s456_s3, 4  ;;  %s250_s1 = int_to_ptr.vmem [resolvable:$true] %s249_s1  ;;  %s252_s26 = int_to_ptr.hbm [resolvable:$true] %s251_s26 }
  0x16   :  { %s402_s27 = smov [#allocation8]   ;;  %s237_s4 = sshll.u32 %s455_s2, 4  ;;  %s238_s4 = int_to_ptr.hbm [resolvable:$true] %s237_s4 }
  0x17   :  { %60 = vst [vmem:[#allocation8] sm:$0xf] %v59_v11  ;;  %vm66_vm1 = vcmp.gt.f32.partialorder %v65_v12, 1.0  ;;  %v72_v15 = vmul.f32 0.95122945, %v65_v12  ;;  %v195_v11 = vld [vmem:[#allocation3 + $0x68] sm:$0xff] }
  0x18   :  { %v268_v16 = vsel %vm66_vm1, 1.0, %v400_v9  ;;  %s235_s28 = sshll.u32 %s402_s27, 4  ;;  %s403_s3 = smov 64   ;;  %s236_s28 = int_to_ptr.vmem [resolvable:$true] %s235_s28 }
  0x19   :  { %v69_v17 = vpack.c.bf16 %v268_v16, %v268_v16  ;;  %v76_v18 = vadd.f32 %v75_v13, %v72_v15  ;;  %v196_v16 = vmul.f32 0.30848432, %v195_v11  ;;  %s404_s5 = smov 4  }
  0x1b   :  { %71 = vst [vmem:[#allocation8 + $0x4] sm:$0xf] %v69_v17  ;;  %vm77_vm2 = vcmp.gt.f32.partialorder %v76_v18, 1.0  ;;  %v83_v21 = vmul.f32 0.95122945, %v76_v18  ;;  %v206_v17 = vld [vmem:[#allocation3 + $0x70] sm:$0xff] }
  0x1c   :  { %v269_v22 = vsel %vm77_vm2, 1.0, %v400_v9 }
  0x1d   :  { %v80_v23 = vpack.c.bf16 %v269_v22, %v269_v22  ;;  %v87_v24 = vadd.f32 %v86_v19, %v83_v21  ;;  %v207_v22 = vmul.f32 0.30848432, %v206_v17 }
  0x1f   :  { %82 = vst [vmem:[#allocation8 + $0x8] sm:$0xf] %v80_v23  ;;  %vm88_vm3 = vcmp.gt.f32.partialorder %v87_v24, 1.0  ;;  %v94_v27 = vmul.f32 0.95122945, %v87_v24  ;;  %v217_v23 = vld [vmem:[#allocation3 + $0x78] sm:$0xff] }
  0x20   :  { %v270_v28 = vsel %vm88_vm3, 1.0, %v400_v9 }
  0x21   :  { %v91_v29 = vpack.c.bf16 %v270_v28, %v270_v28  ;;  %v98_v30 = vadd.f32 %v97_v25, %v94_v27  ;;  %v218_v28 = vmul.f32 0.30848432, %v217_v23 }
  0x23   :  { %93 = vst [vmem:[#allocation8 + $0xc] sm:$0xf] %v91_v29  ;;  %vm99_vm4 = vcmp.gt.f32.partialorder %v98_v30, 1.0  ;;  %v105_v33 = vmul.f32 0.95122945, %v98_v30 }
  0x24   :  { %v271_v34 = vsel %vm99_vm4, 1.0, %v400_v9 }
  0x25   :  { %v102_v35 = vpack.c.bf16 %v271_v34, %v271_v34  ;;  %v109_v36 = vadd.f32 %v108_v31, %v105_v33 }
  0x27   :  { %104 = vst [vmem:[#allocation8 + $0x10] sm:$0xf] %v102_v35  ;;  %vm110_vm5 = vcmp.gt.f32.partialorder %v109_v36, 1.0  ;;  %v116_v39 = vmul.f32 0.95122945, %v109_v36 }
  0x28   :  { %v272_v40 = vsel %vm110_vm5, 1.0, %v400_v9 }
  0x29   :  { %v113_v41 = vpack.c.bf16 %v272_v40, %v272_v40  ;;  %v120_v42 = vadd.f32 %v119_v37, %v116_v39 }
  0x2b   :  { %115 = vst [vmem:[#allocation8 + $0x14] sm:$0xf] %v113_v41  ;;  %vm121_vm6 = vcmp.gt.f32.partialorder %v120_v42, 1.0  ;;  %v127_v45 = vmul.f32 0.95122945, %v120_v42 }
  0x2c   :  { %v273_v46 = vsel %vm121_vm6, 1.0, %v400_v9 }
  0x2d   :  { %v124_v47 = vpack.c.bf16 %v273_v46, %v273_v46  ;;  %v131_v48 = vadd.f32 %v130_v43, %v127_v45 }
  0x2f   :  { %126 = vst [vmem:[#allocation8 + $0x18] sm:$0xf] %v124_v47  ;;  %vm132_vm7 = vcmp.gt.f32.partialorder %v131_v48, 1.0  ;;  %v138_v51 = vmul.f32 0.95122945, %v131_v48 }
  0x30   :  { %v274_v52 = vsel %vm132_vm7, 1.0, %v400_v9 }
  0x31   :  { %v135_v53 = vpack.c.bf16 %v274_v52, %v274_v52  ;;  %v142_v54 = vadd.f32 %v141_v49, %v138_v51 }
  0x33   :  { %137 = vst [vmem:[#allocation8 + $0x1c] sm:$0xf] %v135_v53  ;;  %vm143_vm8 = vcmp.gt.f32.partialorder %v142_v54, 1.0  ;;  %v149_v57 = vmul.f32 0.95122945, %v142_v54 }
  0x34   :  { %v275_v58 = vsel %vm143_vm8, 1.0, %v400_v9 }
  0x35   :  { %v146_v59 = vpack.c.bf16 %v275_v58, %v275_v58  ;;  %v153_v60 = vadd.f32 %v152_v55, %v149_v57 }
  0x37   :  { %148 = vst [vmem:[#allocation8 + $0x20] sm:$0xf] %v146_v59  ;;  %vm154_vm9 = vcmp.gt.f32.partialorder %v153_v60, 1.0  ;;  %v160_v63 = vmul.f32 0.95122945, %v153_v60 }
  0x38   :  { %v276_v0 = vsel %vm154_vm9, 1.0, %v400_v9 }
  0x39   :  { %v157_v1 = vpack.c.bf16 %v276_v0, %v276_v0  ;;  %v164_v2 = vadd.f32 %v163_v61, %v160_v63 }
  0x3b   :  { %159 = vst [vmem:[#allocation8 + $0x24] sm:$0xf] %v157_v1  ;;  %vm165_vm10 = vcmp.gt.f32.partialorder %v164_v2, 1.0  ;;  %v171_v5 = vmul.f32 0.95122945, %v164_v2 }
  0x3c   :  { %v277_v6 = vsel %vm165_vm10, 1.0, %v400_v9 }
  0x3d   :  { %v168_v7 = vpack.c.bf16 %v277_v6, %v277_v6  ;;  %v175_v8 = vadd.f32 %v174_v3, %v171_v5 }
  0x3f   :  { %170 = vst [vmem:[#allocation8 + $0x28] sm:$0xf] %v168_v7  ;;  %vm176_vm11 = vcmp.gt.f32.partialorder %v175_v8, 1.0  ;;  %v182_v12 = vmul.f32 0.95122945, %v175_v8 }
  0x40   :  { %v278_v13 = vsel %vm176_vm11, 1.0, %v400_v9 }
  0x41   :  { %v179_v14 = vpack.c.bf16 %v278_v13, %v278_v13  ;;  %v186_v15 = vadd.f32 %v185_v10, %v182_v12 }
  0x43   :  { %181 = vst [vmem:[#allocation8 + $0x2c] sm:$0xf] %v179_v14  ;;  %vm187_vm12 = vcmp.gt.f32.partialorder %v186_v15, 1.0  ;;  %v193_v18 = vmul.f32 0.95122945, %v186_v15 }
  0x44   :  { %v279_v19 = vsel %vm187_vm12, 1.0, %v400_v9 }
  0x45   :  { %v190_v20 = vpack.c.bf16 %v279_v19, %v279_v19  ;;  %v197_v21 = vadd.f32 %v196_v16, %v193_v18 }
  0x47   :  { %192 = vst [vmem:[#allocation8 + $0x30] sm:$0xf] %v190_v20  ;;  %vm198_vm13 = vcmp.gt.f32.partialorder %v197_v21, 1.0  ;;  %v204_v24 = vmul.f32 0.95122945, %v197_v21 }
  0x48   :  { %v280_v25 = vsel %vm198_vm13, 1.0, %v400_v9 }
  0x49   :  { %v201_v26 = vpack.c.bf16 %v280_v25, %v280_v25  ;;  %v208_v27 = vadd.f32 %v207_v22, %v204_v24 }
  0x4b   :  { %203 = vst [vmem:[#allocation8 + $0x34] sm:$0xf] %v201_v26  ;;  %vm209_vm14 = vcmp.gt.f32.partialorder %v208_v27, 1.0  ;;  %v215_v29 = vmul.f32 0.95122945, %v208_v27 }
  0x4c   :  { %v281_v30 = vsel %vm209_vm14, 1.0, %v400_v9 }
  0x4d   :  { %v212_v31 = vpack.c.bf16 %v281_v30, %v281_v30  ;;  %v219_v32 = vadd.f32 %v218_v28, %v215_v29 }
  0x4f   :  { %214 = vst [vmem:[#allocation8 + $0x38] sm:$0xf] %v212_v31  ;;  %vm220_vm15 = vcmp.gt.f32.partialorder %v219_v32, 1.0 }
  0x50   :  { %v282_v33 = vsel %vm220_vm15, 1.0, %v400_v9  ;;  %230 = vst [vmem:[#allocation9] sm:$0xff] %v219_v32 }
  0x51   :  { %v223_v34 = vpack.c.bf16 %v282_v33, %v282_v33  ;;  %254 = dma.vmem_to_hbm [thread:$0]  %s250_s1, 128, %s252_s26, [#allocation10]  }
  0x53   :  { %225 = vst [vmem:[#allocation8 + $0x3c] sm:$0xf] %v223_v34 }
  0x54   :  { %243 = dma.vmem_to_hbm [thread:$0]  %s236_s28, 1024, %s238_s4, [#allocation5], %s403_s3, %s403_s3, %s404_s5  }
  0x55   :  { %392 = dma.done.wait [#allocation5], 1024  }
  0x56   :  { %393 = vsyncadd [#allocation5], 4294966272 }
  0x57   :  { %394 = dma.done.wait [#allocation10], 128  }
  0x58   :  { %395 = vsyncadd [#allocation10], 4294967168 }
  0x59   :  { %263 = vsyncpa [#allocation4], 1 }
  0x5a   :  { %264 = vsyncpa [#allocation7], 1 }
  0x5b   :  { %265 = vsyncpa [#allocation5], 1 }
  0x5c   :  { %266 = vsyncpa [#allocation10], 1 }

</bundles_post_ra>
